<compile_context>
chip_gen: v7x
topology: tpu7x:2x2x1
jax: 0.10.0
libtpu: 0.0.40
codegen_flags: <defaults>
</compile_context>

<pallas_src>
import jax
import jax.numpy as jnp
from jax.experimental import pallas as pl
from jax.experimental.pallas import tpu as pltpu


def ffn_kernel(x_ref, w1_ref, w2_ref, b2_ref, o_ref, acc_ref):
    # x_ref:  (tm, d_model)   w1_ref: (d_model, tff)   w2_ref: (tff, d_model)
    # b2_ref: (1, d_model) f32 folded bias (b1 @ W2 + b2)
    # o_ref:  (tm, d_model)   acc_ref: (tm, d_model) f32, resident across the d_ff axis.
    j = pl.program_id(1)

    @pl.when(j == 0)
    def _init():
        acc_ref[...] = jnp.zeros_like(acc_ref)

    # Partial hidden slice h_j = x @ W1[:, j*tff:(j+1)*tff]; dropout (eval) is identity.
    h = jnp.dot(x_ref[...], w1_ref[...], preferred_element_type=jnp.float32)
    w2 = w2_ref[...]
    acc_ref[...] += jnp.dot(h.astype(w2.dtype), w2, preferred_element_type=jnp.float32)

    @pl.when(j == pl.num_programs(1) - 1)
    def _finalize():
        o_ref[...] = (acc_ref[...] + b2_ref[...]).astype(o_ref.dtype)


def _round_up(v, mult):
    return ((v + mult - 1) // mult) * mult


def _sublane(itemsize):
    if itemsize >= 4:
        return 8
    if itemsize == 2:
        return 16
    return 32


def _vmem_capacity_and_cores():
    """Best-effort (physical VMEM bytes, # TensorCores the parallel axis is sharded over)."""
    kind = ""
    try:
        kind = jax.devices()[0].device_kind.lower()
    except Exception:
        pass
    is_v7 = ("v7" in kind) or ("7x" in kind)
    vmem = (64 << 20) if is_v7 else (128 << 20)
    n_tc = 2 if is_v7 else 1
    try:
        info = pltpu.get_tpu_info()
        vmem = int(getattr(info, "vmem_capacity_bytes", vmem))
    except Exception:
        pass
    return vmem, n_tc


def _vmem_estimate(tm, tff, d_model, x_bp, w_bp):
    return (2 * 2 * tm * d_model * x_bp        # x-in + out tiles, double buffered
            + 2 * 2 * d_model * tff * w_bp     # W1 + W2 slices, double buffered
            + 2 * 2 * d_model * 4              # folded bias (f32), double buffered
            + tm * d_model * 4                 # f32 accumulator scratch
            + tm * tff * 4)                    # (tm, tff) f32 intermediate h


_MIN_TM = 256


def _select_tiles(m, d_model, d_ff, x_bp, w_bp, vmem_budget, n_tc):
    sub = _sublane(x_bp)
    # Row tile: target 1024 rows (keeps the kernel MXU-bound instead of weight-stream bound
    # on v6e/v7x bf16), rounded to the dtype's sublane multiple, never larger than needed.
    tm = min(1024, _round_up(max(m, sub), sub))
    # Dual-TensorCore chips: make sure the "parallel" row axis has >= n_tc tiles.
    floor_tm = max(_MIN_TM, sub)
    while n_tc > 1 and pl.cdiv(m, tm) < n_tc and tm > floor_tm:
        tm = max(floor_tm, _round_up(tm // 2, sub))

    # d_ff tile: biggest MXU-friendly divisor; fall back to the full d_ff for irregular sizes.
    tff_cands = [c for c in (2048, 1024, 512, 256, 128) if d_ff % c == 0] or [d_ff]

    # Shrink tff first (only per-step overhead), then tm (arithmetic intensity), to fit VMEM.
    while True:
        for tff in tff_cands:
            if _vmem_estimate(tm, tff, d_model, x_bp, w_bp) <= vmem_budget:
                return tm, tff
        if tm <= floor_tm:
            return tm, tff_cands[-1]      # best effort; vmem_limit is raised to the estimate
        tm = max(floor_tm, _round_up(tm // 2, sub))


def feed_forward_block(x, w1, b1, w2, b2, *, tm=None, tff=None, compute_dtype=None):
    """x: (batch, seq, d_model) -> (batch, seq, d_model).

    compute_dtype: optionally cast x/W1/W2 (e.g. to jnp.bfloat16 on v5e) while keeping
    f32 accumulation and the original output dtype.
    """
    batch, seq, d_model = x.shape
    d_ff = w1.shape[1]
    m = batch * seq
    x2d = x.reshape(m, d_model)
    out_dtype = x.dtype

    if compute_dtype is not None:
        x2d = x2d.astype(compute_dtype)
        w1 = w1.astype(compute_dtype)
        w2 = w2.astype(compute_dtype)

    # Fold b1 into the output bias: (x@W1 + b1)@W2 + b2 == x@W1@W2 + (b1@W2 + b2).
    b2_eff = (jnp.dot(b1.astype(jnp.float32), w2.astype(jnp.float32),
                      precision=jax.lax.Precision.HIGHEST)
              + b2.astype(jnp.float32)).reshape(1, d_model)

    x_bp = jnp.dtype(x2d.dtype).itemsize
    w_bp = jnp.dtype(w1.dtype).itemsize

    vmem_capacity, n_tc = _vmem_capacity_and_cores()
    vmem_budget = vmem_capacity * 3 // 4      # ~96 MiB on v5e/v6e, ~48 MiB on v7x

    if tm is None or tff is None:
        sel_tm, sel_tff = _select_tiles(m, d_model, d_ff, x_bp, w_bp, vmem_budget, n_tc)
        if tm is None:
            tm = sel_tm
        if tff is None:
            tff = sel_tff
    assert d_ff % tff == 0, "d_ff tile must divide d_ff (ragged d_ff would corrupt the sum)"
    assert tm % 8 == 0 or tm == m, "row tile must be a multiple of 8 sublanes"

    est = _vmem_estimate(tm, tff, d_model, x_bp, w_bp)
    vmem_limit = int(min(max(2 * est, 32 << 20), vmem_budget))
    if est > vmem_limit:                       # over-budget fallback (irregular shapes)
        vmem_limit = int(min(est + (4 << 20), vmem_capacity * 9 // 10))

    # Ragged M: rely on Pallas partial-last-block masking (no pad / slice, no extra HBM pass).
    grid = (pl.cdiv(m, tm), d_ff // tff)

    out2d = pl.pallas_call(
        ffn_kernel,
        out_shape=jax.ShapeDtypeStruct((m, d_model), out_dtype),
        grid_spec=pltpu.PrefetchScalarGridSpec(
            num_scalar_prefetch=0,
            grid=grid,
            in_specs=[
                pl.BlockSpec((tm, d_model), lambda i, j: (i, 0)),    # x rows
                pl.BlockSpec((d_model, tff), lambda i, j: (0, j)),   # W1 slice
                pl.BlockSpec((tff, d_model), lambda i, j: (j, 0)),   # W2 slice
                pl.BlockSpec((1, d_model), lambda i, j: (0, 0)),     # folded bias
            ],
            out_specs=pl.BlockSpec((tm, d_model), lambda i, j: (i, 0)),
            scratch_shapes=[pltpu.VMEM((tm, d_model), jnp.float32)],
        ),
        compiler_params=pltpu.CompilerParams(
            dimension_semantics=("parallel", "arbitrary"),
            vmem_limit_bytes=vmem_limit,
        ),
    )(x2d, w1, w2, b2_eff)

    return out2d.reshape(batch, seq, d_model)


def init_params(key, d_model, d_ff, dtype=jnp.float32):
    """Deterministic nn.Linear-style init (uniform +/- 1/sqrt(fan_in))."""
    k1, k2, k3, k4 = jax.random.split(key, 4)
    bound1 = 1.0 / (d_model ** 0.5)
    bound2 = 1.0 / (d_ff ** 0.5)
    # stored transposed relative to PyTorch's (out_features, in_features)
    w1 = jax.random.uniform(k1, (d_model, d_ff), dtype, -bound1, bound1)
    b1 = jax.random.uniform(k2, (d_ff,), dtype, -bound1, bound1)
    w2 = jax.random.uniform(k3, (d_ff, d_model), dtype, -bound2, bound2)
    b2 = jax.random.uniform(k4, (d_model,), dtype, -bound2, bound2)
    return w1, b1, w2, b2


def ffn_reference(x, w1, b1, w2, b2):
    """Pure-JAX reference (eval-mode dropout == identity)."""
    b, s, d_model = x.shape
    x2 = x.reshape(-1, d_model)
    h = jnp.dot(x2, w1, precision=jax.lax.Precision.HIGHEST) + b1
    y = jnp.dot(h, w2, precision=jax.lax.Precision.HIGHEST) + b2
    return y.reshape(b, s, d_model)


if __name__ == "__main__":
    key = jax.random.PRNGKey(0)

    # --- small smoke test (single tile, irregular d_ff fallback) ---
    batch, seq, d_model, d_ff = 2, 8, 32, 64
    kx, kp, key = jax.random.split(key, 3)
    x = jax.random.normal(kx, (batch, seq, d_model), jnp.float32)
    w1, b1, w2, b2 = init_params(kp, d_model, d_ff)

    out = jax.block_until_ready(feed_forward_block(x, w1, b1, w2, b2))
    ref = ffn_reference(x, w1, b1, w2, b2)
    assert out.shape == (batch, seq, d_model)
    assert jnp.allclose(out, ref, atol=1e-4, rtol=1e-4)

    # --- explicit tiles: ragged row axis (m=400, tm=128) + multi-step d_ff reduction ---
    batch2, seq2, d_model2, d_ff2 = 2, 200, 128, 512
    kx2, kp2, key = jax.random.split(key, 3)
    x2 = jax.random.normal(kx2, (batch2, seq2, d_model2), jnp.float32)
    w1b, b1b, w2b, b2b = init_params(kp2, d_model2, d_ff2)

    out2 = jax.block_until_ready(
        feed_forward_block(x2, w1b, b1b, w2b, b2b, tm=128, tff=256))
    ref2 = ffn_reference(x2, w1b, b1b, w2b, b2b)
    assert out2.shape == (batch2, seq2, d_model2)
    assert jnp.allclose(out2, ref2, atol=2e-3, rtol=2e-3)

    # --- default (auto) tiles: multiple row tiles with a ragged last block ---
    batch3, seq3, d_model3, d_ff3 = 2, 640, 128, 1024
    kx3, kp3 = jax.random.split(key)
    x3 = jax.random.normal(kx3, (batch3, seq3, d_model3), jnp.float32)
    w1c, b1c, w2c, b2c = init_params(kp3, d_model3, d_ff3)

    out3 = jax.block_until_ready(feed_forward_block(x3, w1c, b1c, w2c, b2c))
    ref3 = ffn_reference(x3, w1c, b1c, w2c, b2c)
    assert out3.shape == (batch3, seq3, d_model3)
    assert jnp.allclose(out3, ref3, atol=2e-3, rtol=2e-3)

    print("KERNEL_OK")
</pallas_src>

<mosaic_0001>
module attributes {stable_mosaic.version = 11 : i64} {
  func.func @ffn_kernel(%arg0: i32, %arg1: i32, %arg2: memref<16x32xf32, #tpu.memory_space<vmem>>, %arg3: memref<32x64xf32, #tpu.memory_space<vmem>>, %arg4: memref<64x32xf32, #tpu.memory_space<vmem>>, %arg5: memref<1x32xf32, #tpu.memory_space<vmem>>, %arg6: memref<16x32xf32, #tpu.memory_space<vmem>>, %arg7: memref<16x32xf32, #tpu.memory_space<vmem>>) attributes {dimension_semantics = [#tpu.dimension_semantics<parallel>, #tpu.dimension_semantics<arbitrary>], iteration_bounds = array<i64: 1, 1>, scalar_prefetch = 0 : i64, scratch_operands = 1 : i64, tpu.core_type = #tpu.core_type<tc>, window_params = [{transform_indices = @transform_0, window_bounds = array<i64: 16, 32>}, {transform_indices = @transform_1, window_bounds = array<i64: 32, 64>}, {transform_indices = @transform_2, window_bounds = array<i64: 64, 32>}, {pipeline_mode = #tpu.pipeline_mode<synchronous>, transform_indices = @transform_3, window_bounds = array<i64: 1, 32>}, {transform_indices = @transform_4, window_bounds = array<i64: 16, 32>}]} {
    %c0_i32 = arith.constant 0 : i32
    %0 = arith.cmpi eq, %arg1, %c0_i32 : i32
    %1 = arith.extui %0 : i1 to i32
    %c0_i32_0 = arith.constant 0 : i32
    %2 = arith.cmpi ne, %1, %c0_i32_0 : i32
    scf.if %2 {
      %cst_13 = arith.constant 0.000000e+00 : f32
      %14 = vector.broadcast %cst_13 : f32 to vector<16x32xf32>
      %c0_14 = arith.constant 0 : index
      %c0_15 = arith.constant 0 : index
      %15 = vector.load %arg7[%c0_14, %c0_15] : memref<16x32xf32, #tpu.memory_space<vmem>>, vector<16x32xf32>
      tpu.vector_store %arg7[%c0_14, %c0_15], %14 {strides = array<i32>} : memref<16x32xf32, #tpu.memory_space<vmem>>, vector<16x32xf32>,
    } else {
    }
    %c0 = arith.constant 0 : index
    %c0_1 = arith.constant 0 : index
    %3 = vector.load %arg2[%c0, %c0_1] : memref<16x32xf32, #tpu.memory_space<vmem>>, vector<16x32xf32>
    %c0_2 = arith.constant 0 : index
    %c0_3 = arith.constant 0 : index
    %4 = vector.load %arg3[%c0_2, %c0_3] : memref<32x64xf32, #tpu.memory_space<vmem>>, vector<32x64xf32>
    %cst = arith.constant dense<0.000000e+00> : vector<16x64xf32>
    %5 = tpu.matmul %3, %4, %cst {dimension_numbers = #tpu.dot_dimension_numbers<[1], [0], [0], [1], [0, 0, 1, 1], [], []>} : vector<16x32xf32>, vector<32x64xf32>, vector<16x64xf32> -> vector<16x64xf32>
    %c0_4 = arith.constant 0 : index
    %c0_5 = arith.constant 0 : index
    %6 = vector.load %arg4[%c0_4, %c0_5] : memref<64x32xf32, #tpu.memory_space<vmem>>, vector<64x32xf32>
    %c0_6 = arith.constant 0 : index
    %c0_7 = arith.constant 0 : index
    %7 = vector.load %arg7[%c0_6, %c0_7] : memref<16x32xf32, #tpu.memory_space<vmem>>, vector<16x32xf32>
    %cst_8 = arith.constant dense<0.000000e+00> : vector<16x32xf32>
    %8 = tpu.matmul %5, %6, %cst_8 {dimension_numbers = #tpu.dot_dimension_numbers<[1], [0], [0], [1], [0, 0, 1, 1], [], []>} : vector<16x64xf32>, vector<64x32xf32>, vector<16x32xf32> -> vector<16x32xf32>
    %9 = arith.addf %7, %8 : vector<16x32xf32>
    %c0_9 = arith.constant 0 : index
    %c0_10 = arith.constant 0 : index
    %10 = vector.load %arg7[%c0_9, %c0_10] : memref<16x32xf32, #tpu.memory_space<vmem>>, vector<16x32xf32>
    tpu.vector_store %arg7[%c0_9, %c0_10], %9 {strides = array<i32>} : memref<16x32xf32, #tpu.memory_space<vmem>>, vector<16x32xf32>,
    %c0_i32_11 = arith.constant 0 : i32
    %11 = arith.cmpi eq, %arg1, %c0_i32_11 : i32
    %12 = arith.extui %11 : i1 to i32
    %c0_i32_12 = arith.constant 0 : i32
    %13 = arith.cmpi ne, %12, %c0_i32_12 : i32
    scf.if %13 {
      %c0_13 = arith.constant 0 : index
      %c0_14 = arith.constant 0 : index
      %14 = vector.load %arg7[%c0_13, %c0_14] : memref<16x32xf32, #tpu.memory_space<vmem>>, vector<16x32xf32>
      %c0_15 = arith.constant 0 : index
      %c0_16 = arith.constant 0 : index
      %15 = vector.load %arg5[%c0_15, %c0_16] : memref<1x32xf32, #tpu.memory_space<vmem>>, vector<1x32xf32>
      %16 = vector.broadcast %15 : vector<1x32xf32> to vector<16x32xf32>
      %17 = arith.addf %14, %16 : vector<16x32xf32>
      %c0_17 = arith.constant 0 : index
      %c0_18 = arith.constant 0 : index
      %18 = vector.load %arg6[%c0_17, %c0_18] : memref<16x32xf32, #tpu.memory_space<vmem>>, vector<16x32xf32>
      tpu.vector_store %arg6[%c0_17, %c0_18], %17 {strides = array<i32>} : memref<16x32xf32, #tpu.memory_space<vmem>>, vector<16x32xf32>,
    } else {
    }
    return
  }
  func.func @transform_0(%arg0: i32, %arg1: i32) -> (i32, i32) {
    %c0_i32 = arith.constant 0 : i32
    %c0_i32_0 = arith.constant 0 : i32
    return %arg0, %c0_i32 : i32, i32
  }
  func.func @transform_1(%arg0: i32, %arg1: i32) -> (i32, i32) {
    %c0_i32 = arith.constant 0 : i32
    %c0_i32_0 = arith.constant 0 : i32
    return %c0_i32, %arg1 : i32, i32
  }
  func.func @transform_2(%arg0: i32, %arg1: i32) -> (i32, i32) {
    %c0_i32 = arith.constant 0 : i32
    %c0_i32_0 = arith.constant 0 : i32
    return %arg1, %c0_i32 : i32, i32
  }
  func.func @transform_3(%arg0: i32, %arg1: i32) -> (i32, i32) {
    %c0_i32 = arith.constant 0 : i32
    %c0_i32_0 = arith.constant 0 : i32
    %c0_i32_1 = arith.constant 0 : i32
    return %c0_i32, %c0_i32_0 : i32, i32
  }
  func.func @transform_4(%arg0: i32, %arg1: i32) -> (i32, i32) {
    %c0_i32 = arith.constant 0 : i32
    %c0_i32_0 = arith.constant 0 : i32
    return %arg0, %c0_i32 : i32, i32
  }
}

</mosaic_0001>

<bundles_post_ra>
// kernel: tpu_custom_call.1
= control target key start
LH: loop header
LB: loop body
LE: loop exit
PB: predicated region body
PF: predicated region fallthrough
CT: control target
= control target key end

     0   :  { %vm22_vm0 = vcmask 261120   ;;  %s438_s0 = inlined_call_operand.vmem [shape: f32[16,32], index: 0, kind: input, shape index: {}]   ;;  %s439_s1 = inlined_call_operand.vmem [shape: f32[32,64], index: 1, kind: input, shape index: {}]   ;;  %s440_s2 = inlined_call_operand.vmem [shape: f32[64,32], index: 2, kind: input, shape index: {}]   ;;  %s441_s3 = inlined_call_operand.vmem [shape: f32[1,32], index: 3, kind: input, shape index: {}]   ;;  %s442_s4 = inlined_call_operand.hbm [shape: f32[16,32], index: 4, kind: output, shape index: {}]  }
   0x1   :  { %v27_v0 = vld [vmem:[%s439_s1] sm:$0xff]  ;;  %v28_v1 = vld [vmem:[%s439_s1 + $0x8] sm:$0xff]  ;;  %v29_v2 = vld [vmem:[%s439_s1 + $0x10] sm:$0xff] }
   0x2   :  { %v292_v3 = vpack.c.bf16 %v28_v1, %v27_v0  ;;  %v30_v4 = vld [vmem:[%s439_s1 + $0x18] sm:$0xff]  ;;  %v25_v5 = vld [vmem:[%s438_s0] sm:$0xff]  ;;  %v114_v8 = vld [vmem:[%s440_s2 + $0x8] sm:$0xff] }
   0x3   :  { %v296_v6 = vpack.c.bf16 %v30_v4, %v29_v2  ;;  %270 = vmatprep.mubr.msk.f32.mxu0 %vm22_vm0, %v25_v5  ;;  %v113_v7 = vld [vmem:[%s440_s2] sm:$0xff]  ;;  %v115_v9 = vld [vmem:[%s440_s2 + $0x10] sm:$0xff]  ;;  %v116_v11 = vld [vmem:[%s440_s2 + $0x18] sm:$0xff] }
   0x4   :  { %293 = vmatprep.subr.bf16.mxu0 %v292_v3  ;;  %v300_v10 = vpack.c.bf16 %v114_v8, %v113_v7  ;;  %v304_v12 = vpack.c.bf16 %v116_v11, %v115_v9  ;;  %v117_v13 = vld [vmem:[%s440_s2 + $0x20] sm:$0xff]  ;;  %v118_v14 = vld [vmem:[%s440_s2 + $0x28] sm:$0xff] }
   0x5   :  { %295 = vmatpush3.bf16.msra.mxu0 %v292_v3 }
   0x6   :  { %9 = vsyncpa [#allocation4], 0  ;;  %297 = vmatprep.subr.bf16.mxu0 %v296_v6  ;;  %301 = vmatprep.subr.bf16.mxu1 %v300_v10  ;;  %v308_v15 = vpack.c.bf16 %v118_v14, %v117_v13  ;;  %v26_v16 = vld [vmem:[%s438_s0 + $0x8] sm:$0xff]  ;;  %v119_v17 = vld [vmem:[%s440_s2 + $0x30] sm:$0xff]  ;;  %v344_v20 = vmov 0.0   ;;  %vm123_vm1 = vcmask 523264  }
   0x7   :  { %303 = vmatpush3.bf16.msra.mxu1 %v300_v10  ;;  %v120_v18 = vld [vmem:[%s440_s2 + $0x38] sm:$0xff]  ;;  %24 = vst.msk [vmem:[#allocation2 + $0x8] sm:$0xff] %vm22_vm0, %v344_v20  ;;  %23 = vst.msk [vmem:[#allocation2] sm:$0xff] %vm22_vm0, %v344_v20  ;;  %v245_v29 = vld [vmem:[%s441_s3] ss:$0 sm:$0xff]  ;;  %s345_s16 = smov [#allocation3]  }
   0x8   :  { %305 = vmatprep.subr.bf16.mxu1 %v304_v12  ;;  %v312_v19 = vpack.c.bf16 %v120_v18, %v119_v17  ;;  %s230_s17 = sshll.u32 %s345_s16, 4  ;;  %s231_s17 = int_to_ptr.vmem [resolvable:$true] %s230_s17 }
   0x9   :  { %299 = vmatpush3.bf16.msra.mxu0 %v296_v6  ;;  %s320_s18 = scalar_lea.vmem %s231_s17, 256  ;;  %p325_p1 = scmp.lt.s32.totalorder %s231_s17, %s231_s17 }
   0xa   :  { %p321_p0 = scmp.ne.s32.totalorder %s231_s17, %s320_s18  ;;  %p326_p2 = scmp.lt.s32.totalorder %s320_s18, %s320_s18 }
   0xb   :  { %307 = vmatpush3.bf16.msra.mxu1 %v304_v12 }
   0xc   :  { %271 = vmatmul.mubr.msk.f32.vlgmr.msra.gmra.mrb[0].mxu0 %vm22_vm0, %v26_v16  ;;  %309 = vmatprep.subr.bf16.mxu1 %v308_v15  ;;  %p327_p3 = por %p326_p2, %p325_p1 }
   0xe   :  { %v122_v23 = vld [vmem:[#allocation2 + $0x8] sm:$0xff]  ;;  %v121_v24 = vld [vmem:[#allocation2] sm:$0xff]  ;;  %p328_p4 = pnand %p327_p3, %p321_p0 }
   0xf   :  { %311 = vmatpush3.bf16.msra.mxu1 %v308_v15 }
  0x10   :  { %313 = vmatprep.subr.bf16.mxu1 %v312_v19 }
  0x13   :  { %315 = vmatpush3.bf16.msra.mxu1 %v312_v19 }
  0xdf   :  { %v272_v21 = vpop.f32.mrb[0].mxu0 }
  0xe0   :  { %v104_v22 = vpop.f32.mrb[1].mxu0 }
  0xe1   :  { %289 = vmatprep.mubr.msk.f32.mxu1 %vm123_vm1, %v104_v22 }
  0xe2   :  { %290 = vmatmul.mubr.msk.f32.vlgmr.msra.gmra.mrb[0].mxu1 %vm123_vm1, %v272_v21 }
 0x1b5   :  { %v291_v25 = vpop.f32.mrb[0].mxu1 }
 0x1b6   :  { %v206_v26 = vadd.f32 %v291_v25, %v122_v23  ;;  %v196_v27 = vpop.f32.mrb[1].mxu1 }
 0x1b7   :  { %v205_v28 = vadd.f32 %v196_v27, %v121_v24 }
 0x1b8   :  { %208 = vst.msk [vmem:[#allocation2 + $0x8] sm:$0xff] %vm22_vm0, %v206_v26 }
 0x1b9   :  { %207 = vst.msk [vmem:[#allocation2] sm:$0xff] %vm22_vm0, %v205_v28 }
 0x1bf   :  { %v213_v30 = vld [vmem:[#allocation2 + $0x8] sm:$0xff] }
 0x1c0   :  { %v212_v31 = vld [vmem:[#allocation2] sm:$0xff]  ;;  %v222_v32 = vadd.f32 %v245_v29, %v213_v30 }
 0x1c1   :  { %v221_v33 = vadd.f32 %v245_v29, %v212_v31 }
 0x1c2   :  { %224 = vst.msk [vmem:[#allocation3 + $0x8] sm:$0xff] %vm22_vm0, %v222_v32 }
 0x1c3   :  { %223 = vst.msk [vmem:[#allocation3] sm:$0xff] %vm22_vm0, %v221_v33 }
 0x1c4   :  { %331 = shalt.err (!%p328_p4)
}
 0x1c5   :  { %s332_s20 = scalar_lea.hbm %s442_s4, 256 }
 0x1c6   :  { %p333_p5 = scmp.ne.s32.totalorder %s442_s4, %s332_s20  ;;  %p336_p6 = scmp.lt.u32.totalorder %s332_s20, %s442_s4 }
 0x1c8   :  { %p338_p7 = pnand %p336_p6, %p333_p5 }
 0x1ca   :  { %341 = shalt.err (!%p338_p7)
}
 0x1cb   :  { %s346_s25 = smov 128   ;;  %s347_s26 = smov 8  }
 0x1cc   :  { %236 = dma.vmem_to_hbm [thread:$0]  %s231_s17, 256, %s442_s4, [#allocation4], %s346_s25, %s346_s25, %s347_s26  }
 0x1cd   :  { %342 = dma.done.wait [#allocation4], 256  }
 0x1ce   :  { %343 = vsyncadd [#allocation4], 4294967040 }
 0x1cf   :  { %240 = vsyncpa [#allocation4], 1 }

</bundles_post_ra>
